<compile_context>
chip_gen: v7x
topology: tpu7x:2x2x1
jax: 0.10.0
libtpu: 0.0.40
codegen_flags: <defaults>
</compile_context>

<pallas_src>
import functools

import jax
import jax.numpy as jnp
from jax import lax
from jax.experimental import pallas as pl
from jax.experimental.pallas import tpu as pltpu

_MM_DTYPE = jnp.bfloat16  # MXU-native input dtype; accumulate/epilogue in f32


# --------------------------------------------------------------------------
# Pallas kernel: batched fused matmul + activation, lane-dense output layout
#   out[g, R, M] = lhs[g, R, K] @ rhs[g, K, M]
# M (last dim / lanes) is the large flattened spatial axis.
# --------------------------------------------------------------------------
def _matmul_act_kernel(lhs_ref, rhs_ref, o_ref, *, activation):
    acc = jnp.dot(lhs_ref[0], rhs_ref[0], preferred_element_type=jnp.float32)
    if activation == "relu":
        acc = jnp.maximum(acc, 0.0)
    elif activation == "softmax_rows":
        # channel softmax: reduce over the small leading (sublane) axis,
        # every lane stays busy with spatial positions.
        m = jnp.max(acc, axis=0, keepdims=True)
        e = jnp.exp(acc - m)
        denom = jnp.sum(e, axis=0, keepdims=True)
        r = pl.reciprocal(denom, approx=True)      # EUP slot (nearly free)
        r = r * (2.0 - denom * r)                  # one Newton step -> ~f32 exact
        acc = e * r
    o_ref[0] = acc.astype(o_ref.dtype)


def _pick_lane_tile(C, max_tile=512):
    """Largest multiple-of-128 tile <= max_tile that divides C, else full C."""
    if C <= max_tile:
        return C
    t = (max_tile // 128) * 128
    while t >= 128:
        if C % t == 0:
            return t
        t -= 128
    return C


def matmul_act(lhs, rhs, activation, out_dtype=jnp.float32, max_tile=512):
    G, R, K = lhs.shape
    G2, K2, C = rhs.shape
    assert G == G2 and K == K2
    tc = _pick_lane_tile(C, max_tile)
    return pl.pallas_call(
        functools.partial(_matmul_act_kernel, activation=activation),
        out_shape=jax.ShapeDtypeStruct((G, R, C), out_dtype),
        grid=(G, C // tc),
        in_specs=[
            pl.BlockSpec((1, R, K), lambda g, i: (g, 0, 0)),   # small weight: resident
            pl.BlockSpec((1, K, tc), lambda g, i: (g, 0, i)),  # patches: lane-tiled
        ],
        out_specs=pl.BlockSpec((1, R, tc), lambda g, i: (g, 0, i)),
        compiler_params=pltpu.CompilerParams(
            dimension_semantics=("parallel", "parallel"),  # phases & lane tiles indep.
            vmem_limit_bytes=32 * 1024 * 1024,
        ),
    )(lhs, rhs)


# --------------------------------------------------------------------------
# Glue (plain JAX around the pallas_calls). Activations are carried in
# channel-major CNHW layout (C, N, H, W) -> zero inter-layer transposes.
# --------------------------------------------------------------------------
def _im2col_t(x_pad, K, Hout, Wout):
    # x_pad: (Cin, N, Hp, Wp) -> patches^T: (K*K*Cin, N*Hout*Wout),
    # row index = (ky*K + kx)*Cin + ci, col index = n*Hout*Wout + oy*Wout + ox.
    Cin = x_pad.shape[0]
    cols = []
    for ky in range(K):
        for kx in range(K):
            cols.append(x_pad[:, :, ky:ky + Hout, kx:kx + Wout])
    p = jnp.stack(cols, axis=0)                     # (K*K, Cin, N, Hout, Wout)
    return p.reshape(K * K * Cin, -1)


def conv2d_cnhw(x_cnhw, w_mat, K, padding, activation, out_dtype):
    # x_cnhw: (Cin, N, H, W); w_mat: (Cout, K*K*Cin)
    Cin, N, H, W = x_cnhw.shape
    x_pad = jnp.pad(x_cnhw, ((0, 0), (0, 0), (padding, padding), (padding, padding)))
    Hout = H + 2 * padding - K + 1
    Wout = W + 2 * padding - K + 1
    patches = _im2col_t(x_pad, K, Hout, Wout).astype(_MM_DTYPE)
    o = matmul_act(w_mat[None], patches[None], activation, out_dtype)[0]
    return o.reshape(w_mat.shape[0], N, Hout, Wout)


def conv_transpose2d_s2_cnhw(x_cnhw, w_phases, activation, out_dtype):
    # Sub-pixel decomposition of ConvTranspose2d(K=4, stride=2, padding=1):
    # output parity phase (ry, rx) is a dense 2x2 stride-1 conv of the input.
    #   out[co, n, 2q+ry, 2p+rx] = sum_{ci,dy,dx} x_pad[ci, n, ry+dy+q, rx+dx+p]
    #                                           * w[ci, co, (3-ry)-2dy, (3-rx)-2dx]
    Cin, N, H, W = x_cnhw.shape
    Cout = w_phases.shape[1]
    x_pad = jnp.pad(x_cnhw, ((0, 0), (0, 0), (1, 1), (1, 1)))
    phase_patches = []
    for ry in range(2):
        for rx in range(2):
            taps = [x_pad[:, :, ry + dy:ry + dy + H, rx + dx:rx + dx + W]
                    for dy in range(2) for dx in range(2)]
            phase_patches.append(jnp.stack(taps, 0).reshape(4 * Cin, N * H * W))
    patches = jnp.stack(phase_patches, 0).astype(_MM_DTYPE)     # (4, 4*Cin, M)
    o = matmul_act(w_phases, patches, activation, out_dtype)    # (4, Cout, M)
    o = o.reshape(2, 2, Cout, N, H, W).transpose(2, 3, 4, 0, 5, 1)
    return o.reshape(Cout, N, 2 * H, 2 * W)                     # CNHW for next layer


# --------------------------------------------------------------------------
# Model: parameter construction mirrors DCGAN_G_nobn.__init__
# Weight matrices are prepared once in matmul layout, bf16; raw f32 weights
# are kept alongside for the in-script reference check.
# --------------------------------------------------------------------------
def init_dcgan_g_nobn(key, isize, nz, nc, ngf, n_extra_layers=0):
    assert isize % 16 == 0, "isize has to be a multiple of 16"
    cngf, tisize = ngf // 2, 4
    while tisize != isize:
        cngf *= 2
        tisize *= 2

    def nrm(k, shape):
        return jax.random.normal(k, shape, jnp.float32) * 0.02  # DCGAN-style init

    def conv_mat(w):   # w: (Cout, Cin, K, K) -> (Cout, K*K*Cin)
        return w.transpose(0, 2, 3, 1).reshape(w.shape[0], -1)

    def convt_s2_phase_mat(w):  # w: (Cin, Cout, 4, 4) -> (4, Cout, 4*Cin)
        Cin, Cout = w.shape[0], w.shape[1]
        mats = []
        for ry in range(2):
            for rx in range(2):
                taps = [w[:, :, (3 - ry) - 2 * dy, (3 - rx) - 2 * dx]
                        for dy in range(2) for dx in range(2)]   # each (Cin, Cout)
                m = jnp.stack(taps, 0)                           # (4, Cin, Cout)
                mats.append(m.transpose(2, 0, 1).reshape(Cout, 4 * Cin))
        return jnp.stack(mats, 0)

    layers = []
    # initial ConvTranspose2d(nz, cngf, 4, 1, 0) on a 1x1 input is a dense matmul:
    # out[n, co, ky, kx] = sum_ci x[n, ci] * w[ci, co, ky, kx]
    key, k = jax.random.split(key)
    w0 = nrm(k, (nz, cngf, 4, 4))
    layers.append(dict(kind="initial_mm",
                       mat=w0.reshape(nz, cngf * 16).astype(_MM_DTYPE),
                       raw=w0, cout=cngf, act="relu"))
    csize = 4
    while csize < isize // 2:
        key, k = jax.random.split(key)
        w = nrm(k, (cngf, cngf // 2, 4, 4))
        layers.append(dict(kind="convt_s2",
                           mat=convt_s2_phase_mat(w).astype(_MM_DTYPE),
                           raw=w, act="relu"))
        cngf //= 2
        csize *= 2
    for _ in range(n_extra_layers):
        key, k = jax.random.split(key)
        w = nrm(k, (cngf, cngf, 3, 3))
        layers.append(dict(kind="conv", mat=conv_mat(w).astype(_MM_DTYPE),
                           raw=w, K=3, padding=1, act="relu"))
    key, k = jax.random.split(key)
    # final "tanh"-named layer is nn.Softmax() in the reference -> channel softmax
    w = nrm(k, (cngf, nc, 4, 4))
    layers.append(dict(kind="convt_s2",
                       mat=convt_s2_phase_mat(w).astype(_MM_DTYPE),
                       raw=w, act="softmax_rows"))
    return layers


def dcgan_g_nobn_forward(layers, x):
    # x: (N, nz, 1, 1)  NCHW, same as the PyTorch module
    N = x.shape[0]
    l0 = layers[0]
    cngf = l0["cout"]
    x2 = x.reshape(N, -1).astype(_MM_DTYPE)                         # (N, nz)
    o = matmul_act(x2[None], l0["mat"][None], l0["act"], _MM_DTYPE)[0]
    act = o.reshape(N, cngf, 4, 4).transpose(1, 0, 2, 3)            # -> CNHW carried
    for layer in layers[1:]:
        is_last = layer["act"] == "softmax_rows"
        out_dtype = jnp.float32 if is_last else _MM_DTYPE
        if layer["kind"] == "convt_s2":
            act = conv_transpose2d_s2_cnhw(act, layer["mat"], layer["act"], out_dtype)
        else:
            act = conv2d_cnhw(act, layer["mat"], layer["K"], layer["padding"],
                              layer["act"], out_dtype)
    # CNHW -> NCHW once at the very end
    return act.transpose(1, 0, 2, 3)


# --------------------------------------------------------------------------
# Pure-XLA reference of the same (bf16-quantized) network for validation.
# --------------------------------------------------------------------------
def _ref_forward(layers, x):
    act = x.astype(_MM_DTYPE).astype(jnp.float32)
    for layer in layers:
        w = layer["raw"].astype(_MM_DTYPE).astype(jnp.float32)
        if layer["kind"] == "initial_mm":      # ConvTranspose2d(nz, cngf, 4, 1, 0)
            out = lax.conv_general_dilated(
                act, jnp.flip(w, (2, 3)).transpose(1, 0, 2, 3),
                window_strides=(1, 1), padding=[(3, 3), (3, 3)],
                dimension_numbers=("NCHW", "OIHW", "NCHW"))
        elif layer["kind"] == "convt_s2":      # ConvTranspose2d(., ., 4, 2, 1)
            out = lax.conv_general_dilated(
                act, jnp.flip(w, (2, 3)).transpose(1, 0, 2, 3),
                window_strides=(1, 1), padding=[(2, 2), (2, 2)],
                lhs_dilation=(2, 2),
                dimension_numbers=("NCHW", "OIHW", "NCHW"))
        else:                                  # Conv2d(., ., 3, 1, 1)
            p = layer["padding"]
            out = lax.conv_general_dilated(
                act, w, (1, 1), [(p, p), (p, p)],
                dimension_numbers=("NCHW", "OIHW", "NCHW"))
        if layer["act"] == "relu":
            act = jnp.maximum(out, 0.0).astype(_MM_DTYPE).astype(jnp.float32)
        else:
            act = jax.nn.softmax(out, axis=1)
    return act


if __name__ == "__main__":
    isize, nz, nc, ngf = 16, 8, 3, 4
    n_extra_layers = 1
    batch = 2

    key = jax.random.PRNGKey(0)
    key, kx = jax.random.split(key)
    layers = init_dcgan_g_nobn(key, isize, nz, nc, ngf, n_extra_layers)
    x = jax.random.normal(kx, (batch, nz, 1, 1), jnp.float32)

    fwd = jax.jit(functools.partial(dcgan_g_nobn_forward, layers))
    out = jax.block_until_ready(fwd(x))
    assert out.shape == (batch, nc, isize, isize), out.shape

    # final layer is Softmax over dim=1 -> channel sums must be ~1
    chan_sums = jnp.sum(out, axis=1)
    assert bool(jnp.allclose(chan_sums, 1.0, atol=1e-3)), "channel softmax check failed"

    # numerics check against the pure-XLA reference of the same bf16 network
    ref = jax.block_until_ready(jax.jit(functools.partial(_ref_forward, layers))(x))
    assert bool(jnp.allclose(out, ref, atol=2e-2)), \
        ("mismatch vs reference", float(jnp.max(jnp.abs(out - ref))))

    print("KERNEL_OK")
</pallas_src>

<mosaic_0001>
module attributes {stable_mosaic.version = 11 : i64} {
  func.func @_matmul_act_kernel(%arg0: i32, %arg1: i32, %arg2: memref<1x2x8xbf16, #tpu.memory_space<vmem>>, %arg3: memref<1x8x128xbf16, #tpu.memory_space<vmem>>, %arg4: memref<1x2x128xbf16, #tpu.memory_space<vmem>>) attributes {dimension_semantics = [#tpu.dimension_semantics<parallel>, #tpu.dimension_semantics<parallel>], iteration_bounds = array<i64: 1, 1>, scalar_prefetch = 0 : i64, scratch_operands = 0 : i64, tpu.core_type = #tpu.core_type<tc>, window_params = [{transform_indices = @transform_0, window_bounds = array<i64: 1, 2, 8>}, {transform_indices = @transform_1, window_bounds = array<i64: 1, 8, 128>}, {transform_indices = @transform_2, window_bounds = array<i64: 1, 2, 128>}]} {
    %c0 = arith.constant 0 : index
    %c0_0 = arith.constant 0 : index
    %c0_1 = arith.constant 0 : index
    %0 = vector.load %arg2[%c0, %c0_0, %c0_1] : memref<1x2x8xbf16, #tpu.memory_space<vmem>>, vector<1x2x8xbf16>
    %1 = vector.shape_cast %0 : vector<1x2x8xbf16> to vector<2x8xbf16>
    %c0_2 = arith.constant 0 : index
    %c0_3 = arith.constant 0 : index
    %c0_4 = arith.constant 0 : index
    %2 = vector.load %arg3[%c0_2, %c0_3, %c0_4] : memref<1x8x128xbf16, #tpu.memory_space<vmem>>, vector<1x8x128xbf16>
    %3 = vector.shape_cast %2 : vector<1x8x128xbf16> to vector<8x128xbf16>
    %cst = arith.constant dense<0.000000e+00> : vector<2x128xf32>
    %4 = tpu.matmul %1, %3, %cst {dimension_numbers = #tpu.dot_dimension_numbers<[1], [0], [0], [1], [0, 0, 1, 1], [], []>} : vector<2x8xbf16>, vector<8x128xbf16>, vector<2x128xf32> -> vector<2x128xf32>
    %cst_5 = arith.constant 0.000000e+00 : f32
    %5 = vector.broadcast %cst_5 : f32 to vector<2x128xf32>
    %6 = arith.maximumf %4, %5 : vector<2x128xf32>
    %7 = arith.truncf %6 : vector<2x128xf32> to vector<2x128xbf16>
    %c0_6 = arith.constant 0 : index
    %c0_7 = arith.constant 0 : index
    %c0_8 = arith.constant 0 : index
    %8 = vector.load %arg4[%c0_6, %c0_7, %c0_8] : memref<1x2x128xbf16, #tpu.memory_space<vmem>>, vector<1x2x128xbf16>
    %9 = vector.shape_cast %8 : vector<1x2x128xbf16> to vector<2x128xbf16>
    %10 = vector.shape_cast %7 : vector<2x128xbf16> to vector<1x2x128xbf16>
    tpu.vector_store %arg4[%c0_6, %c0_7, %c0_8], %10 {strides = array<i32>} : memref<1x2x128xbf16, #tpu.memory_space<vmem>>, vector<1x2x128xbf16>,
    return
  }
  func.func @transform_0(%arg0: i32, %arg1: i32) -> (i32, i32, i32) {
    %c0_i32 = arith.constant 0 : i32
    %c0_i32_0 = arith.constant 0 : i32
    %c0_i32_1 = arith.constant 0 : i32
    return %arg0, %c0_i32, %c0_i32_0 : i32, i32, i32
  }
  func.func @transform_1(%arg0: i32, %arg1: i32) -> (i32, i32, i32) {
    %c0_i32 = arith.constant 0 : i32
    %c0_i32_0 = arith.constant 0 : i32
    return %arg0, %c0_i32, %arg1 : i32, i32, i32
  }
  func.func @transform_2(%arg0: i32, %arg1: i32) -> (i32, i32, i32) {
    %c0_i32 = arith.constant 0 : i32
    %c0_i32_0 = arith.constant 0 : i32
    return %arg0, %c0_i32, %arg1 : i32, i32, i32
  }
}

module attributes {stable_mosaic.version = 11 : i64} {
  func.func @_matmul_act_kernel(%arg0: i32, %arg1: i32, %arg2: memref<1x4x32xbf16, #tpu.memory_space<vmem>>, %arg3: memref<1x32x32xbf16, #tpu.memory_space<vmem>>, %arg4: memref<1x4x32xbf16, #tpu.memory_space<vmem>>) attributes {dimension_semantics = [#tpu.dimension_semantics<parallel>, #tpu.dimension_semantics<parallel>], iteration_bounds = array<i64: 4, 1>, scalar_prefetch = 0 : i64, scratch_operands = 0 : i64, tpu.core_type = #tpu.core_type<tc>, window_params = [{transform_indices = @transform_0, window_bounds = array<i64: 1, 4, 32>}, {transform_indices = @transform_1, window_bounds = array<i64: 1, 32, 32>}, {transform_indices = @transform_2, window_bounds = array<i64: 1, 4, 32>}]} {
    %c0 = arith.constant 0 : index
    %c0_0 = arith.constant 0 : index
    %c0_1 = arith.constant 0 : index
    %0 = vector.load %arg2[%c0, %c0_0, %c0_1] : memref<1x4x32xbf16, #tpu.memory_space<vmem>>, vector<1x4x32xbf16>
    %1 = vector.shape_cast %0 : vector<1x4x32xbf16> to vector<4x32xbf16>
    %c0_2 = arith.constant 0 : index
    %c0_3 = arith.constant 0 : index
    %c0_4 = arith.constant 0 : index
    %2 = vector.load %arg3[%c0_2, %c0_3, %c0_4] : memref<1x32x32xbf16, #tpu.memory_space<vmem>>, vector<1x32x32xbf16>
    %3 = vector.shape_cast %2 : vector<1x32x32xbf16> to vector<32x32xbf16>
    %cst = arith.constant dense<0.000000e+00> : vector<4x32xf32>
    %4 = tpu.matmul %1, %3, %cst {dimension_numbers = #tpu.dot_dimension_numbers<[1], [0], [0], [1], [0, 0, 1, 1], [], []>} : vector<4x32xbf16>, vector<32x32xbf16>, vector<4x32xf32> -> vector<4x32xf32>
    %cst_5 = arith.constant 0.000000e+00 : f32
    %5 = vector.broadcast %cst_5 : f32 to vector<4x32xf32>
    %6 = arith.maximumf %4, %5 : vector<4x32xf32>
    %7 = arith.truncf %6 : vector<4x32xf32> to vector<4x32xbf16>
    %c0_6 = arith.constant 0 : index
    %c0_7 = arith.constant 0 : index
    %c0_8 = arith.constant 0 : index
    %8 = vector.load %arg4[%c0_6, %c0_7, %c0_8] : memref<1x4x32xbf16, #tpu.memory_space<vmem>>, vector<1x4x32xbf16>
    %9 = vector.shape_cast %8 : vector<1x4x32xbf16> to vector<4x32xbf16>
    %10 = vector.shape_cast %7 : vector<4x32xbf16> to vector<1x4x32xbf16>
    tpu.vector_store %arg4[%c0_6, %c0_7, %c0_8], %10 {strides = array<i32>} : memref<1x4x32xbf16, #tpu.memory_space<vmem>>, vector<1x4x32xbf16>,
    return
  }
  func.func @transform_0(%arg0: i32, %arg1: i32) -> (i32, i32, i32) {
    %c0_i32 = arith.constant 0 : i32
    %c0_i32_0 = arith.constant 0 : i32
    %c0_i32_1 = arith.constant 0 : i32
    return %arg0, %c0_i32, %c0_i32_0 : i32, i32, i32
  }
  func.func @transform_1(%arg0: i32, %arg1: i32) -> (i32, i32, i32) {
    %c0_i32 = arith.constant 0 : i32
    %c0_i32_0 = arith.constant 0 : i32
    return %arg0, %c0_i32, %arg1 : i32, i32, i32
  }
  func.func @transform_2(%arg0: i32, %arg1: i32) -> (i32, i32, i32) {
    %c0_i32 = arith.constant 0 : i32
    %c0_i32_0 = arith.constant 0 : i32
    return %arg0, %c0_i32, %arg1 : i32, i32, i32
  }
}

module attributes {stable_mosaic.version = 11 : i64} {
  func.func @_matmul_act_kernel(%arg0: i32, %arg1: i32, %arg2: memref<1x4x36xbf16, #tpu.memory_space<vmem>>, %arg3: memref<1x36x128xbf16, #tpu.memory_space<vmem>>, %arg4: memref<1x4x128xbf16, #tpu.memory_space<vmem>>) attributes {dimension_semantics = [#tpu.dimension_semantics<parallel>, #tpu.dimension_semantics<parallel>], iteration_bounds = array<i64: 1, 1>, scalar_prefetch = 0 : i64, scratch_operands = 0 : i64, tpu.core_type = #tpu.core_type<tc>, window_params = [{transform_indices = @transform_0, window_bounds = array<i64: 1, 4, 36>}, {transform_indices = @transform_1, window_bounds = array<i64: 1, 36, 128>}, {transform_indices = @transform_2, window_bounds = array<i64: 1, 4, 128>}]} {
    %c0 = arith.constant 0 : index
    %c0_0 = arith.constant 0 : index
    %c0_1 = arith.constant 0 : index
    %0 = vector.load %arg2[%c0, %c0_0, %c0_1] : memref<1x4x36xbf16, #tpu.memory_space<vmem>>, vector<1x4x36xbf16>
    %1 = vector.shape_cast %0 : vector<1x4x36xbf16> to vector<4x36xbf16>
    %c0_2 = arith.constant 0 : index
    %c0_3 = arith.constant 0 : index
    %c0_4 = arith.constant 0 : index
    %2 = vector.load %arg3[%c0_2, %c0_3, %c0_4] : memref<1x36x128xbf16, #tpu.memory_space<vmem>>, vector<1x36x128xbf16>
    %3 = vector.shape_cast %2 : vector<1x36x128xbf16> to vector<36x128xbf16>
    %cst = arith.constant dense<0.000000e+00> : vector<4x128xf32>
    %4 = tpu.matmul %1, %3, %cst {dimension_numbers = #tpu.dot_dimension_numbers<[1], [0], [0], [1], [0, 0, 1, 1], [], []>} : vector<4x36xbf16>, vector<36x128xbf16>, vector<4x128xf32> -> vector<4x128xf32>
    %cst_5 = arith.constant 0.000000e+00 : f32
    %5 = vector.broadcast %cst_5 : f32 to vector<4x128xf32>
    %6 = arith.maximumf %4, %5 : vector<4x128xf32>
    %7 = arith.truncf %6 : vector<4x128xf32> to vector<4x128xbf16>
    %c0_6 = arith.constant 0 : index
    %c0_7 = arith.constant 0 : index
    %c0_8 = arith.constant 0 : index
    %8 = vector.load %arg4[%c0_6, %c0_7, %c0_8] : memref<1x4x128xbf16, #tpu.memory_space<vmem>>, vector<1x4x128xbf16>
    %9 = vector.shape_cast %8 : vector<1x4x128xbf16> to vector<4x128xbf16>
    %10 = vector.shape_cast %7 : vector<4x128xbf16> to vector<1x4x128xbf16>
    tpu.vector_store %arg4[%c0_6, %c0_7, %c0_8], %10 {strides = array<i32>} : memref<1x4x128xbf16, #tpu.memory_space<vmem>>, vector<1x4x128xbf16>,
    return
  }
  func.func @transform_0(%arg0: i32, %arg1: i32) -> (i32, i32, i32) {
    %c0_i32 = arith.constant 0 : i32
    %c0_i32_0 = arith.constant 0 : i32
    %c0_i32_1 = arith.constant 0 : i32
    return %arg0, %c0_i32, %c0_i32_0 : i32, i32, i32
  }
  func.func @transform_1(%arg0: i32, %arg1: i32) -> (i32, i32, i32) {
    %c0_i32 = arith.constant 0 : i32
    %c0_i32_0 = arith.constant 0 : i32
    return %arg0, %c0_i32, %arg1 : i32, i32, i32
  }
  func.func @transform_2(%arg0: i32, %arg1: i32) -> (i32, i32, i32) {
    %c0_i32 = arith.constant 0 : i32
    %c0_i32_0 = arith.constant 0 : i32
    return %arg0, %c0_i32, %arg1 : i32, i32, i32
  }
}

module attributes {stable_mosaic.version = 11 : i64} {
  func.func @_matmul_act_kernel(%arg0: i32, %arg1: i32, %arg2: memref<1x3x16xbf16, #tpu.memory_space<vmem>>, %arg3: memref<1x16x128xbf16, #tpu.memory_space<vmem>>, %arg4: memref<1x3x128xf32, #tpu.memory_space<vmem>>) attributes {dimension_semantics = [#tpu.dimension_semantics<parallel>, #tpu.dimension_semantics<parallel>], iteration_bounds = array<i64: 4, 1>, scalar_prefetch = 0 : i64, scratch_operands = 0 : i64, tpu.core_type = #tpu.core_type<tc>, window_params = [{transform_indices = @transform_0, window_bounds = array<i64: 1, 3, 16>}, {transform_indices = @transform_1, window_bounds = array<i64: 1, 16, 128>}, {transform_indices = @transform_2, window_bounds = array<i64: 1, 3, 128>}]} {
    %c0 = arith.constant 0 : index
    %c0_0 = arith.constant 0 : index
    %c0_1 = arith.constant 0 : index
    %0 = vector.load %arg2[%c0, %c0_0, %c0_1] : memref<1x3x16xbf16, #tpu.memory_space<vmem>>, vector<1x3x16xbf16>
    %1 = vector.shape_cast %0 : vector<1x3x16xbf16> to vector<3x16xbf16>
    %c0_2 = arith.constant 0 : index
    %c0_3 = arith.constant 0 : index
    %c0_4 = arith.constant 0 : index
    %2 = vector.load %arg3[%c0_2, %c0_3, %c0_4] : memref<1x16x128xbf16, #tpu.memory_space<vmem>>, vector<1x16x128xbf16>
    %3 = vector.shape_cast %2 : vector<1x16x128xbf16> to vector<16x128xbf16>
    %cst = arith.constant dense<0.000000e+00> : vector<3x128xf32>
    %4 = tpu.matmul %1, %3, %cst {dimension_numbers = #tpu.dot_dimension_numbers<[1], [0], [0], [1], [0, 0, 1, 1], [], []>} : vector<3x16xbf16>, vector<16x128xbf16>, vector<3x128xf32> -> vector<3x128xf32>
    %cst_5 = arith.constant dense<0xFF800000> : vector<128xf32>
    %5 = vector.multi_reduction <maximumf>, %4, %cst_5 [0] : vector<3x128xf32> to vector<128xf32>
    %6 = vector.shape_cast %5 : vector<128xf32> to vector<1x128xf32>
    %7 = vector.broadcast %6 : vector<1x128xf32> to vector<3x128xf32>
    %8 = arith.subf %4, %7 : vector<3x128xf32>
    %9 = math.exp %8 : vector<3x128xf32>
    %cst_6 = arith.constant dense<0.000000e+00> : vector<128xf32>
    %10 = vector.multi_reduction <add>, %9, %cst_6 [0] : vector<3x128xf32> to vector<128xf32>
    %11 = vector.shape_cast %10 : vector<128xf32> to vector<1x128xf32>
    %12 = tpu.reciprocal %11 {approx = true} : vector<1x128xf32> -> vector<1x128xf32>
    %13 = arith.mulf %11, %12 : vector<1x128xf32>
    %cst_7 = arith.constant 2.000000e+00 : f32
    %14 = vector.broadcast %cst_7 : f32 to vector<1x128xf32>
    %15 = arith.subf %14, %13 : vector<1x128xf32>
    %16 = arith.mulf %12, %15 : vector<1x128xf32>
    %17 = vector.broadcast %16 : vector<1x128xf32> to vector<3x128xf32>
    %18 = arith.mulf %9, %17 : vector<3x128xf32>
    %c0_8 = arith.constant 0 : index
    %c0_9 = arith.constant 0 : index
    %c0_10 = arith.constant 0 : index
    %19 = vector.load %arg4[%c0_8, %c0_9, %c0_10] : memref<1x3x128xf32, #tpu.memory_space<vmem>>, vector<1x3x128xf32>
    %20 = vector.shape_cast %19 : vector<1x3x128xf32> to vector<3x128xf32>
    %21 = vector.shape_cast %18 : vector<3x128xf32> to vector<1x3x128xf32>
    tpu.vector_store %arg4[%c0_8, %c0_9, %c0_10], %21 {strides = array<i32>} : memref<1x3x128xf32, #tpu.memory_space<vmem>>, vector<1x3x128xf32>,
    return
  }
  func.func @transform_0(%arg0: i32, %arg1: i32) -> (i32, i32, i32) {
    %c0_i32 = arith.constant 0 : i32
    %c0_i32_0 = arith.constant 0 : i32
    %c0_i32_1 = arith.constant 0 : i32
    return %arg0, %c0_i32, %c0_i32_0 : i32, i32, i32
  }
  func.func @transform_1(%arg0: i32, %arg1: i32) -> (i32, i32, i32) {
    %c0_i32 = arith.constant 0 : i32
    %c0_i32_0 = arith.constant 0 : i32
    return %arg0, %c0_i32, %arg1 : i32, i32, i32
  }
  func.func @transform_2(%arg0: i32, %arg1: i32) -> (i32, i32, i32) {
    %c0_i32 = arith.constant 0 : i32
    %c0_i32_0 = arith.constant 0 : i32
    return %arg0, %c0_i32, %arg1 : i32, i32, i32
  }
}

</mosaic_0001>

<bundles_post_ra>
// kernel: squeeze.2
= control target key start
LH: loop header
LB: loop body
LE: loop exit
PB: predicated region body
PF: predicated region fallthrough
CT: control target
= control target key end

     0   :  { %s445_s8 = smov 116   ;;  %s446_s9 = smov 120   ;;  %vm19_vm0 = vcmask 31744   ;;  %v475_v44 = vmov 0.0   ;;  %s617_s0 = inlined_call_operand.vmem [shape: bf16[1,2,128], index: 0, kind: input, shape index: {}]   ;;  %s618_s1 = inlined_call_operand.vmem [shape: bf16[2,8,4,4], index: 1, kind: output, shape index: {}]  }
   0x1   :  { %v14_v0 = vld [vmem:[%s617_s0] sm:$0x1]  ;;  %s444_s0 = smov 124   ;;  %s447_s10 = smov 112  }
   0x2   :  { %v15_v1 = vunpack.c.l.bf16 %v14_v0  ;;  %s448_s11 = smov 108   ;;  %s449_s12 = smov 104  }
   0x3   :  { %s450_s13 = smov 100   ;;  %s451_s14 = smov 96  }
   0x4   :  { %17 = vst [vmem:[#allocation1] sm:$0x3] %v15_v1  ;;  %s452_s15 = smov 92   ;;  %s453_s16 = smov 88  }
   0x5   :  { %s454_s17 = smov 84   ;;  %s455_s18 = smov 80  }
   0x6   :  { %s456_s19 = smov 76   ;;  %s457_s20 = smov 72  }
   0x7   :  { %s458_s21 = smov 68   ;;  %s459_s22 = smov 64  }
   0x8   :  { %s460_s23 = smov 60   ;;  %s461_s24 = smov 56  }
   0x9   :  { %s462_s25 = smov 52   ;;  %s463_s26 = smov 48  }
   0xa   :  { %s464_s27 = smov 44   ;;  %s465_s28 = smov 40  }
   0xb   :  { %v23_v2 = vld [vmem:[#allocation1] sm:$0x3]   ;;  %s466_s29 = smov 36   ;;  %s467_s30 = smov 32  }
   0xc   :  { %v39_v3 = vld [vmem:[#allocation1] sm:$0x3]   ;;  %24 = vrot.lane.b32.xlu0 %v23_v2, %s444_s0  ;;  %s468_s2 = smov 28   ;;  %s469_s3 = smov 24  }
   0xd   :  { %40 = vrot.lane.b32.xlu1 %v39_v3, %s445_s8  ;;  %v31_v4 = vld [vmem:[#allocation1] sm:$0x3]   ;;  %s470_s4 = smov 20   ;;  %s471_s5 = smov 16  }
   0xe   :  { %v47_v5 = vld [vmem:[#allocation1] sm:$0x3]   ;;  %s472_s6 = smov 12   ;;  %s473_s7 = smov 8  }
   0xf   :  { %v55_v6 = vld [vmem:[#allocation1] sm:$0x3]   ;;  %s474_s0 = smov 4  }
  0x10   :  { %32 = vrot.lane.b32.xlu0 %v31_v4, %s446_s9  ;;  %v63_v7 = vld [vmem:[#allocation1] sm:$0x3]  }
  0x11   :  { %48 = vrot.lane.b32.xlu1 %v47_v5, %s447_s10  ;;  %v71_v8 = vld [vmem:[#allocation1] sm:$0x3]  }
  0x12   :  { %v79_v9 = vld [vmem:[#allocation1] sm:$0x3]  }
  0x13   :  { %v18_v10 = vld [vmem:[#allocation1] sm:$0x3]  }
  0x14   :  { %56 = vrot.lane.b32.xlu0 %v55_v6, %s448_s11  ;;  %20 = vst.msk [vmem:[#allocation0] sm:$0x1] %vm19_vm0, %v18_v10   ;;  %22 = vst.msk [vmem:[#allocation0 + $0x3f] sm:$0x2] %vm19_vm0, %v18_v10   ;;  %v87_v11 = vld [vmem:[#allocation1] sm:$0x3]  }
  0x15   :  { %64 = vrot.lane.b32.xlu1 %v63_v7, %s449_s12  ;;  %v95_v12 = vld [vmem:[#allocation1] sm:$0x3]  }
  0x16   :  { %v103_v13 = vld [vmem:[#allocation1] sm:$0x3]  }
  0x17   :  { %v111_v14 = vld [vmem:[#allocation1] sm:$0x3]  }
  0x18   :  { %72 = vrot.lane.b32.xlu0 %v71_v8, %s450_s13  ;;  %v119_v15 = vld [vmem:[#allocation1] sm:$0x3]  }
  0x19   :  { %80 = vrot.lane.b32.xlu1 %v79_v9, %s451_s14  ;;  %v127_v16 = vld [vmem:[#allocation1] sm:$0x3]  }
  0x1a   :  { %v135_v17 = vld [vmem:[#allocation1] sm:$0x3]  }
  0x1b   :  { %v143_v18 = vld [vmem:[#allocation1] sm:$0x3]  }
  0x1c   :  { %88 = vrot.lane.b32.xlu0 %v87_v11, %s452_s15  ;;  %v151_v19 = vld [vmem:[#allocation1] sm:$0x3]  }
  0x1d   :  { %96 = vrot.lane.b32.xlu1 %v95_v12, %s453_s16  ;;  %v159_v20 = vld [vmem:[#allocation1] sm:$0x3]  }
  0x1e   :  { %v167_v21 = vld [vmem:[#allocation1] sm:$0x3]  }
  0x1f   :  { %v175_v22 = vld [vmem:[#allocation1] sm:$0x3]  }
  0x20   :  { %104 = vrot.lane.b32.xlu0 %v103_v13, %s454_s17  ;;  %v183_v23 = vld [vmem:[#allocation1] sm:$0x3]  }
  0x21   :  { %112 = vrot.lane.b32.xlu1 %v111_v14, %s455_s18  ;;  %v191_v24 = vld [vmem:[#allocation1] sm:$0x3]  }
  0x22   :  { %v199_v25 = vld [vmem:[#allocation1] sm:$0x3]  }
  0x23   :  { %v207_v26 = vld [vmem:[#allocation1] sm:$0x3]  }
  0x24   :  { %120 = vrot.lane.b32.xlu0 %v119_v15, %s456_s19  ;;  %v215_v27 = vld [vmem:[#allocation1] sm:$0x3]  }
  0x25   :  { %128 = vrot.lane.b32.xlu1 %v127_v16, %s457_s20  ;;  %v223_v28 = vld [vmem:[#allocation1] sm:$0x3]  }
  0x26   :  { %v231_v29 = vld [vmem:[#allocation1] sm:$0x3]  }
  0x27   :  { %v239_v30 = vld [vmem:[#allocation1] sm:$0x3]  }
  0x28   :  { %136 = vrot.lane.b32.xlu0 %v135_v17, %s458_s21  ;;  %v247_v31 = vld [vmem:[#allocation1] sm:$0x3]  }
  0x29   :  { %144 = vrot.lane.b32.xlu1 %v143_v18, %s459_s22  ;;  %v255_v32 = vld [vmem:[#allocation1] sm:$0x3]  }
  0x2a   :  { %v263_v33 = vld [vmem:[#allocation1] sm:$0x3]  }
  0x2c   :  { %152 = vrot.lane.b32.xlu0 %v151_v19, %s460_s23 }
  0x2d   :  { %160 = vrot.lane.b32.xlu1 %v159_v20, %s461_s24 }
  0x30   :  { %168 = vrot.lane.b32.xlu0 %v167_v21, %s462_s25 }
  0x31   :  { %176 = vrot.lane.b32.xlu1 %v175_v22, %s463_s26 }
  0x34   :  { %184 = vrot.lane.b32.xlu0 %v183_v23, %s464_s27 }
  0x35   :  { %192 = vrot.lane.b32.xlu1 %v191_v24, %s465_s28 }
  0x38   :  { %200 = vrot.lane.b32.xlu0 %v199_v25, %s466_s29 }
  0x39   :  { %208 = vrot.lane.b32.xlu1 %v207_v26, %s467_s30 }
  0x3c   :  { %216 = vrot.lane.b32.xlu0 %v215_v27, %s468_s2 }
  0x3d   :  { %224 = vrot.lane.b32.xlu1 %v223_v28, %s469_s3 }
  0x40   :  { %232 = vrot.lane.b32.xlu0 %v231_v29, %s470_s4 }
  0x41   :  { %240 = vrot.lane.b32.xlu1 %v239_v30, %s471_s5 }
  0x44   :  { %248 = vrot.lane.b32.xlu0 %v247_v31, %s472_s6 }
  0x45   :  { %256 = vrot.lane.b32.xlu1 %v255_v32, %s473_s7 }
  0x48   :  { %264 = vrot.lane.b32.xlu0 %v263_v33, %s474_s0 }
  0x7e   :  { %v25_v34 = vpop.permute.xlu0 %24  }
  0x7f   :  { %v41_v35 = vpop.permute.xlu1 %40   ;;  %28 = vst.msk [vmem:[#allocation0 + $0x1] sm:$0x1] %vm19_vm0, %v25_v34   ;;  %30 = vst.msk [vmem:[#allocation0 + $0x40] sm:$0x2] %vm19_vm0, %v25_v34  }
  0x80   :  { %44 = vst.msk [vmem:[#allocation0 + $0x3] sm:$0x1] %vm19_vm0, %v41_v35   ;;  %46 = vst.msk [vmem:[#allocation0 + $0x42] sm:$0x2] %vm19_vm0, %v41_v35  }
  0x82   :  { %v33_v36 = vpop.permute.xlu0 %32  }
  0x83   :  { %v49_v37 = vpop.permute.xlu1 %48   ;;  %36 = vst.msk [vmem:[#allocation0 + $0x2] sm:$0x1] %vm19_vm0, %v33_v36   ;;  %38 = vst.msk [vmem:[#allocation0 + $0x41] sm:$0x2] %vm19_vm0, %v33_v36  }
  0x84   :  { %52 = vst.msk [vmem:[#allocation0 + $0x8] sm:$0x1] %vm19_vm0, %v49_v37   ;;  %54 = vst.msk [vmem:[#allocation0 + $0x47] sm:$0x2] %vm19_vm0, %v49_v37  }
  0x86   :  { %v57_v38 = vpop.permute.xlu0 %56  }
  0x87   :  { %v65_v39 = vpop.permute.xlu1 %64   ;;  %60 = vst.msk [vmem:[#allocation0 + $0x9] sm:$0x1] %vm19_vm0, %v57_v38   ;;  %62 = vst.msk [vmem:[#allocation0 + $0x48] sm:$0x2] %vm19_vm0, %v57_v38  }
  0x88   :  { %68 = vst.msk [vmem:[#allocation0 + $0xa] sm:$0x1] %vm19_vm0, %v65_v39   ;;  %70 = vst.msk [vmem:[#allocation0 + $0x49] sm:$0x2] %vm19_vm0, %v65_v39  }
  0x8a   :  { %v275_v40 = vld [vmem:[#allocation0] sm:$0xf]  ;;  %v73_v42 = vpop.permute.xlu0 %72  }
  0x8b   :  { %v328_v41 = vld [vmem:[#allocation0 + $0x40] sm:$0xf]  ;;  %v81_v43 = vpop.permute.xlu1 %80   ;;  %76 = vst.msk [vmem:[#allocation0 + $0xb] sm:$0x1] %vm19_vm0, %v73_v42   ;;  %78 = vst.msk [vmem:[#allocation0 + $0x4a] sm:$0x2] %vm19_vm0, %v73_v42   ;;  %v276_v45 = vpack.c.bf16 %v475_v44, %v275_v40 }
  0x8c   :  { %v329_v46 = vpack.c.bf16 %v475_v44, %v328_v41  ;;  %84 = vst.msk [vmem:[#allocation0 + $0x10] sm:$0x1] %vm19_vm0, %v81_v43   ;;  %86 = vst.msk [vmem:[#allocation0 + $0x4f] sm:$0x2] %vm19_vm0, %v81_v43  }
  0x8d   :  { %278 = vst [vmem:[%s618_s1] sm:$0x3] %v276_v45 }
  0x8e   :  { %404 = vst [vmem:[%s618_s1 + $0x10] sm:$0x3] %v329_v46  ;;  %v89_v47 = vpop.permute.xlu0 %88  }
  0x8f   :  { %v97_v48 = vpop.permute.xlu1 %96   ;;  %92 = vst.msk [vmem:[#allocation0 + $0x11] sm:$0x1] %vm19_vm0, %v89_v47   ;;  %94 = vst.msk [vmem:[#allocation0 + $0x50] sm:$0x2] %vm19_vm0, %v89_v47  }
  0x90   :  { %100 = vst.msk [vmem:[#allocation0 + $0x12] sm:$0x1] %vm19_vm0, %v97_v48   ;;  %102 = vst.msk [vmem:[#allocation0 + $0x51] sm:$0x2] %vm19_vm0, %v97_v48  }
  0x92   :  { %v280_v49 = vld [vmem:[#allocation0 + $0x8] sm:$0xf]  ;;  %v105_v51 = vpop.permute.xlu0 %104  }
  0x93   :  { %v335_v50 = vld [vmem:[#allocation0 + $0x48] sm:$0xf]  ;;  %v113_v52 = vpop.permute.xlu1 %112   ;;  %v281_v53 = vpack.c.bf16 %v475_v44, %v280_v49  ;;  %108 = vst.msk [vmem:[#allocation0 + $0x13] sm:$0x1] %vm19_vm0, %v105_v51   ;;  %110 = vst.msk [vmem:[#allocation0 + $0x52] sm:$0x2] %vm19_vm0, %v105_v51  }
  0x94   :  { %v336_v54 = vpack.c.bf16 %v475_v44, %v335_v50  ;;  %116 = vst.msk [vmem:[#allocation0 + $0x18] sm:$0x1] %vm19_vm0, %v113_v52   ;;  %118 = vst.msk [vmem:[#allocation0 + $0x57] sm:$0x2] %vm19_vm0, %v113_v52  }
  0x95   :  { %397 = vst [vmem:[%s618_s1 + $0x2] sm:$0x3] %v281_v53 }
  0x96   :  { %405 = vst [vmem:[%s618_s1 + $0x12] sm:$0x3] %v336_v54  ;;  %v121_v55 = vpop.permute.xlu0 %120  }
  0x97   :  { %v129_v56 = vpop.permute.xlu1 %128   ;;  %124 = vst.msk [vmem:[#allocation0 + $0x19] sm:$0x1] %vm19_vm0, %v121_v55   ;;  %126 = vst.msk [vmem:[#allocation0 + $0x58] sm:$0x2] %vm19_vm0, %v121_v55  }
  0x98   :  { %132 = vst.msk [vmem:[#allocation0 + $0x1a] sm:$0x1] %vm19_vm0, %v129_v56   ;;  %134 = vst.msk [vmem:[#allocation0 + $0x59] sm:$0x2] %vm19_vm0, %v129_v56  }
  0x9a   :  { %v286_v57 = vld [vmem:[#allocation0 + $0x10] sm:$0xf]  ;;  %v137_v59 = vpop.permute.xlu0 %136  }
  0x9b   :  { %v342_v58 = vld [vmem:[#allocation0 + $0x50] sm:$0xf]  ;;  %v145_v60 = vpop.permute.xlu1 %144   ;;  %v287_v61 = vpack.c.bf16 %v475_v44, %v286_v57  ;;  %140 = vst.msk [vmem:[#allocation0 + $0x1b] sm:$0x1] %vm19_vm0, %v137_v59   ;;  %142 = vst.msk [vmem:[#allocation0 + $0x5a] sm:$0x2] %vm19_vm0, %v137_v59  }
  0x9c   :  { %v343_v62 = vpack.c.bf16 %v475_v44, %v342_v58  ;;  %148 = vst.msk [vmem:[#allocation0 + $0x20] sm:$0x1] %vm19_vm0, %v145_v60   ;;  %150 = vst.msk [vmem:[#allocation0 + $0x5f] sm:$0x2] %vm19_vm0, %v145_v60  }
  0x9d   :  { %398 = vst [vmem:[%s618_s1 + $0x4] sm:$0x3] %v287_v61 }
  0x9e   :  { %406 = vst [vmem:[%s618_s1 + $0x14] sm:$0x3] %v343_v62  ;;  %v153_v63 = vpop.permute.xlu0 %152  }
  0x9f   :  { %v161_v0 = vpop.permute.xlu1 %160   ;;  %156 = vst.msk [vmem:[#allocation0 + $0x21] sm:$0x1] %vm19_vm0, %v153_v63   ;;  %158 = vst.msk [vmem:[#allocation0 + $0x60] sm:$0x2] %vm19_vm0, %v153_v63  }
  0xa0   :  { %164 = vst.msk [vmem:[#allocation0 + $0x22] sm:$0x1] %vm19_vm0, %v161_v0   ;;  %166 = vst.msk [vmem:[#allocation0 + $0x61] sm:$0x2] %vm19_vm0, %v161_v0  }
  0xa2   :  { %v293_v1 = vld [vmem:[#allocation0 + $0x18] sm:$0xf]  ;;  %v169_v3 = vpop.permute.xlu0 %168  }
  0xa3   :  { %v349_v2 = vld [vmem:[#allocation0 + $0x58] sm:$0xf]  ;;  %v177_v4 = vpop.permute.xlu1 %176   ;;  %v294_v5 = vpack.c.bf16 %v475_v44, %v293_v1  ;;  %172 = vst.msk [vmem:[#allocation0 + $0x23] sm:$0x1] %vm19_vm0, %v169_v3   ;;  %174 = vst.msk [vmem:[#allocation0 + $0x62] sm:$0x2] %vm19_vm0, %v169_v3  }
  0xa4   :  { %v350_v6 = vpack.c.bf16 %v475_v44, %v349_v2  ;;  %180 = vst.msk [vmem:[#allocation0 + $0x28] sm:$0x1] %vm19_vm0, %v177_v4   ;;  %182 = vst.msk [vmem:[#allocation0 + $0x67] sm:$0x2] %vm19_vm0, %v177_v4  }
  0xa5   :  { %399 = vst [vmem:[%s618_s1 + $0x6] sm:$0x3] %v294_v5 }
  0xa6   :  { %407 = vst [vmem:[%s618_s1 + $0x16] sm:$0x3] %v350_v6  ;;  %v185_v7 = vpop.permute.xlu0 %184  }
  0xa7   :  { %v193_v8 = vpop.permute.xlu1 %192   ;;  %188 = vst.msk [vmem:[#allocation0 + $0x29] sm:$0x1] %vm19_vm0, %v185_v7   ;;  %190 = vst.msk [vmem:[#allocation0 + $0x68] sm:$0x2] %vm19_vm0, %v185_v7  }
  0xa8   :  { %196 = vst.msk [vmem:[#allocation0 + $0x2a] sm:$0x1] %vm19_vm0, %v193_v8   ;;  %198 = vst.msk [vmem:[#allocation0 + $0x69] sm:$0x2] %vm19_vm0, %v193_v8  }
  0xaa   :  { %v300_v9 = vld [vmem:[#allocation0 + $0x20] sm:$0xf]  ;;  %v201_v11 = vpop.permute.xlu0 %200  }
  0xab   :  { %v356_v10 = vld [vmem:[#allocation0 + $0x60] sm:$0xf]  ;;  %v209_v12 = vpop.permute.xlu1 %208   ;;  %v301_v13 = vpack.c.bf16 %v475_v44, %v300_v9  ;;  %204 = vst.msk [vmem:[#allocation0 + $0x2b] sm:$0x1] %vm19_vm0, %v201_v11   ;;  %206 = vst.msk [vmem:[#allocation0 + $0x6a] sm:$0x2] %vm19_vm0, %v201_v11  }
  0xac   :  { %v357_v14 = vpack.c.bf16 %v475_v44, %v356_v10  ;;  %212 = vst.msk [vmem:[#allocation0 + $0x30] sm:$0x1] %vm19_vm0, %v209_v12   ;;  %214 = vst.msk [vmem:[#allocation0 + $0x6f] sm:$0x2] %vm19_vm0, %v209_v12  }
  0xad   :  { %400 = vst [vmem:[%s618_s1 + $0x8] sm:$0x3] %v301_v13 }
  0xae   :  { %408 = vst [vmem:[%s618_s1 + $0x18] sm:$0x3] %v357_v14  ;;  %v217_v15 = vpop.permute.xlu0 %216  }
  0xaf   :  { %v225_v16 = vpop.permute.xlu1 %224   ;;  %220 = vst.msk [vmem:[#allocation0 + $0x31] sm:$0x1] %vm19_vm0, %v217_v15   ;;  %222 = vst.msk [vmem:[#allocation0 + $0x70] sm:$0x2] %vm19_vm0, %v217_v15  }
  0xb0   :  { %228 = vst.msk [vmem:[#allocation0 + $0x32] sm:$0x1] %vm19_vm0, %v225_v16   ;;  %230 = vst.msk [vmem:[#allocation0 + $0x71] sm:$0x2] %vm19_vm0, %v225_v16  }
  0xb2   :  { %v307_v17 = vld [vmem:[#allocation0 + $0x28] sm:$0xf]  ;;  %v233_v19 = vpop.permute.xlu0 %232  }
  0xb3   :  { %v363_v18 = vld [vmem:[#allocation0 + $0x68] sm:$0xf]  ;;  %v241_v20 = vpop.permute.xlu1 %240   ;;  %v308_v21 = vpack.c.bf16 %v475_v44, %v307_v17  ;;  %236 = vst.msk [vmem:[#allocation0 + $0x33] sm:$0x1] %vm19_vm0, %v233_v19   ;;  %238 = vst.msk [vmem:[#allocation0 + $0x72] sm:$0x2] %vm19_vm0, %v233_v19  }
  0xb4   :  { %v364_v22 = vpack.c.bf16 %v475_v44, %v363_v18  ;;  %244 = vst.msk [vmem:[#allocation0 + $0x38] sm:$0x1] %vm19_vm0, %v241_v20   ;;  %246 = vst.msk [vmem:[#allocation0 + $0x77] sm:$0x2] %vm19_vm0, %v241_v20  }
  0xb5   :  { %401 = vst [vmem:[%s618_s1 + $0xa] sm:$0x3] %v308_v21 }
  0xb6   :  { %409 = vst [vmem:[%s618_s1 + $0x1a] sm:$0x3] %v364_v22  ;;  %v249_v23 = vpop.permute.xlu0 %248  }
  0xb7   :  { %v257_v24 = vpop.permute.xlu1 %256   ;;  %252 = vst.msk [vmem:[#allocation0 + $0x39] sm:$0x1] %vm19_vm0, %v249_v23   ;;  %254 = vst.msk [vmem:[#allocation0 + $0x78] sm:$0x2] %vm19_vm0, %v249_v23  }
  0xb8   :  { %260 = vst.msk [vmem:[#allocation0 + $0x3a] sm:$0x1] %vm19_vm0, %v257_v24   ;;  %262 = vst.msk [vmem:[#allocation0 + $0x79] sm:$0x2] %vm19_vm0, %v257_v24  }
  0xba   :  { %v314_v25 = vld [vmem:[#allocation0 + $0x30] sm:$0xf]  ;;  %v265_v27 = vpop.permute.xlu0 %264  }
  0xbb   :  { %v370_v26 = vld [vmem:[#allocation0 + $0x70] sm:$0xf]  ;;  %v315_v28 = vpack.c.bf16 %v475_v44, %v314_v25  ;;  %268 = vst.msk [vmem:[#allocation0 + $0x3b] sm:$0x1] %vm19_vm0, %v265_v27   ;;  %270 = vst.msk [vmem:[#allocation0 + $0x7a] sm:$0x2] %vm19_vm0, %v265_v27  }
  0xbc   :  { %v371_v29 = vpack.c.bf16 %v475_v44, %v370_v26 }
  0xbd   :  { %402 = vst [vmem:[%s618_s1 + $0xc] sm:$0x3] %v315_v28 }
  0xbe   :  { %410 = vst [vmem:[%s618_s1 + $0x1c] sm:$0x3] %v371_v29 }
  0xc2   :  { %v321_v30 = vld [vmem:[#allocation0 + $0x38] sm:$0xf] }
  0xc3   :  { %v377_v31 = vld [vmem:[#allocation0 + $0x78] sm:$0xf]  ;;  %v322_v32 = vpack.c.bf16 %v475_v44, %v321_v30 }
  0xc4   :  { %v378_v33 = vpack.c.bf16 %v475_v44, %v377_v31 }
  0xc5   :  { %403 = vst [vmem:[%s618_s1 + $0xe] sm:$0x3] %v322_v32 }
  0xc6   :  { %411 = vst [vmem:[%s618_s1 + $0x1e] sm:$0x3] %v378_v33 }

// kernel: dcgan_g_nobn_forward.4
= control target key start
LH: loop header
LB: loop body
LE: loop exit
PB: predicated region body
PF: predicated region fallthrough
CT: control target
= control target key end

     0   :  { %vm18_vm0 = vcmask 1043456   ;;  %v80_v0 = vmov 0.0   ;;  %vm81_vm1 = vmmov 0   ;;  %vm14_vm2 = vcmask 64512   ;;  %s106_s1 = inlined_call_operand.vmem [shape: bf16[1,8,128], index: 1, kind: input, shape index: {}]   ;;  %s107_s0 = inlined_call_operand.vmem [shape: bf16[1,2,8], index: 0, kind: input, shape index: {}]   ;;  %s108_s2 = inlined_call_operand.vmem [shape: bf16[1,2,128], index: 2, kind: output, shape index: {}]  }
   0x1   :  { %72 = vmatprep.subr.bf16.mxu0 %v80_v0  ;;  %v13_v1 = vld [vmem:[%s106_s1] sm:$0xf]  ;;  %74 = vmatprep.mubr.msk.bf16.mxu0 %vm81_vm1, %v80_v0 }
   0x2   :  { %v20_v2 = vsel %vm18_vm0, %v13_v1, 0  ;;  %v12_v3 = vld [vmem:[%s107_s0] sm:$0x1] }
   0x3   :  { %73 = vmatpush3.bf16.msra.mxu0 %v20_v2 }
   0x6   :  { %75 = vmatmul.mubr.msk.bf16.vlgmr.msra.gmra.mrb[0].mxu0 %vm14_vm2, %v12_v3 }
  0xd9   :  { %v56_v4 = vpop.f32.mrb[0].mxu0 }
  0xda   :  { %v62_v5 = vmax.f32 %v56_v4, 0.0  ;;  %v76_v6 = vpop.f32.mrb[1].mxu0 }
  0xdb   :  { %v59_v7 = vpop.f32.mrb[2].mxu0 }
  0xdc   :  { %v63_v8 = vpack.c.bf16 %v62_v5, %v62_v5  ;;  %v77_v9 = vpop.f32.mrb[3].mxu0 }
  0xde   :  { %64 = vst [vmem:[%s108_s2] sm:$0x1] %v63_v8 }

// kernel: dcgan_g_nobn_forward.5
= control target key start
LH: loop header
LB: loop body
LE: loop exit
PB: predicated region body
PF: predicated region fallthrough
CT: control target
= control target key end

     0   :  { %s440_s9 = smov 0   ;;  %s442_s10 = smov 0   ;;  %s476_s0 = inlined_call_operand.vmem [shape: bf16[4,4,32], index: 0, kind: input, shape index: {}]   ;;  %s477_s1 = inlined_call_operand.vmem [shape: bf16[4,32,32], index: 1, kind: input, shape index: {}]   ;;  %s478_s2 = inlined_call_operand.vmem [shape: bf16[4,4,32], index: 2, kind: output, shape index: {}]  }
   0x1   :  { %s444_s11 = smov 0  }
   0x2 LB: > { %s24_s12 = sadd.s32 1, %s417_s10  ;;  %p349_p0 = scmp.ge.s32.totalorder %s421_s11, 1  ;;  %s421_s11 = sphi %s444_s11, %s12_s11   ;;  %s417_s10 = sphi %s442_s10, %s480_s10   ;;  %s413_s9 = sphi %s440_s9, %s479_s9  }
   0x3   : > { %p26_p1 = scmp.ge.s32.totalorder %s24_s12, 4  ;;  %p140_p2 = scmp.lt.s32.totalorder %s421_s11, 5 }
   0x5   : > { %s482_s12 = smov (%p26_p1, %s24_s12), 0  ;;  %p141_p3 = pnand %p349_p0, %p140_p2 }
   0x6   : > { %p171_p4 = scmp.lt.s32.totalorder (!%p141_p3), %s413_s9, 3  ;;  %v423_v0 = vmov (!%p141_p3), 0.0   ;;  %vm424_vm0 = vmmov (!%p141_p3), 0   ;;  %vm208_vm1 = vcmask (!%p141_p3), 261120   ;;  %vm254_vm2 = vcmask (!%p141_p3), 254976  }
   0x7   : > { %144 = sbr.rel (%p141_p3) target bundleno = 242 (0xf2), region = 28  ;;  %363 = vmatprep.subr.bf16.mxu0 (!%p141_p3), %v423_v0  ;;  %367 = vmatprep.mubr.msk.bf16.mxu0 (!%p141_p3), %vm424_vm0, %v423_v0 }
   0xe   : > { %s484_s9 = smov (!%p171_p4, %s413_s9), 3 }
   0xf   : > { %s359_s13 = sshll.u32 %s484_s9, 4  ;;  %s350_s17 = sshll.u32 %s484_s9, 1 }
  0x10   : > { %s182_s16 = scalar_lea.vmem %s477_s1, %s359_s13  ;;  %s174_s20 = scalar_lea.vmem %s476_s0, %s350_s17 }
  0x11   : > { %v397_v1 = vld [vmem:[%s182_s16] sm:$0xff]   ;;  %v398_v2 = vld [vmem:[%s182_s16 + $0x8] sm:$0xff]   ;;  %s189_s23 = scalar_lea.vmem %s478_s2, %s350_s17 }
  0x12   : > { %364 = vmatpush3.bf16.msra.mxu0 %v397_v1  ;;  %v191_v3 = vld [vmem:[%s174_s20] sm:$0x3] }
  0x13   : > { %365 = vmatprep.subr.bf16.mxu0 %v423_v0 }
  0x16   : > { %366 = vmatpush3.bf16.msra.mxu0 %v398_v2 }
  0x19   : > { %368 = vmatmul.mubr.msk.bf16.vlgmr.msra.gmra.mrb[0].mxu0 %vm208_vm1, %v191_v3 }
  0xec   : > { %v246_v4 = vpop.f32.mrb[0].mxu0 }
  0xed   : > { %v252_v5 = vmax.f32 %v246_v4, 0.0  ;;  %v369_v6 = vpop.f32.mrb[1].mxu0 }
  0xee   : > { %v249_v7 = vpop.f32.mrb[2].mxu0 }
  0xef   : > { %v253_v8 = vpack.c.bf16 %v252_v5, %v252_v5  ;;  %v370_v9 = vpop.f32.mrb[3].mxu0 }
  0xf1   : > { %255 = vst.msk [vmem:[%s189_s23] sm:$0x3] %vm254_vm2, %v253_v8 }
  0xf2 PF: > { %s12_s11 = sadd.s32 1, %s421_s11   ;;  %s479_s9 = smov %s417_s10 }
  0xf3   : > { %p9_p5 = scmp.ge.s32.totalorder %s12_s11, 6   ;;  %s480_s10 = smov %s482_s12 }
  0xf5   :  { %11 = sbr.rel (!%p9_p5) target bundleno = 2 (0x2), region = 61 }

// kernel: dcgan_g_nobn_forward.6
= control target key start
LH: loop header
LB: loop body
LE: loop exit
PB: predicated region body
PF: predicated region fallthrough
CT: control target
= control target key end

     0   :  { %v111_v0 = vmov 0.0   ;;  %vm112_vm0 = vmmov 0   ;;  %vm37_vm1 = vcmask 1041408   ;;  %vm33_vm2 = vcmask 293888   ;;  %s143_s1 = inlined_call_operand.vmem [shape: bf16[1,36,128], index: 1, kind: input, shape index: {}]   ;;  %s144_s0 = inlined_call_operand.vmem [shape: bf16[1,4,36], index: 0, kind: input, shape index: {}]   ;;  %s145_s2 = inlined_call_operand.vmem [shape: bf16[1,4,128], index: 2, kind: output, shape index: {}]  }
   0x1   :  { %96 = vmatprep.subr.bf16.mxu0 %v111_v0  ;;  %v108_v1 = vld [vmem:[%s143_s1] sm:$0xff]   ;;  %102 = vmatprep.mubr.msk.bf16.mxu0 %vm112_vm0, %v111_v0  ;;  %v109_v2 = vld [vmem:[%s143_s1 + $0x8] sm:$0xff]   ;;  %v110_v3 = vld [vmem:[%s143_s1 + $0x10] ss:$0 sps:$4 sm:$0x33]  }
   0x2   :  { %97 = vmatpush3.bf16.msra.mxu0 %v108_v1  ;;  %v39_v4 = vsel %vm37_vm1, %v110_v3, 0  ;;  %v12_v5 = vld [vmem:[%s144_s0] sm:$0x3] }
   0x3   :  { %98 = vmatprep.subr.bf16.mxu0 %v111_v0 }
   0x6   :  { %99 = vmatpush3.bf16.msra.mxu0 %v109_v2 }
   0x7   :  { %100 = vmatprep.subr.bf16.mxu0 %v111_v0 }
   0xa   :  { %101 = vmatpush3.bf16.msra.mxu0 %v39_v4 }
   0xd   :  { %103 = vmatmul.mubr.msk.bf16.vlgmr.msra.gmra.mrb[0].mxu0 %vm33_vm2, %v12_v5 }
  0xe0   :  { %v75_v6 = vpop.f32.mrb[0].mxu0 }
  0xe1   :  { %v81_v7 = vmax.f32 %v75_v6, 0.0  ;;  %v104_v8 = vpop.f32.mrb[1].mxu0 }
  0xe2   :  { %v78_v9 = vpop.f32.mrb[2].mxu0 }
  0xe3   :  { %v82_v10 = vpack.c.bf16 %v81_v7, %v81_v7  ;;  %v105_v11 = vpop.f32.mrb[3].mxu0 }
  0xe5   :  { %83 = vst [vmem:[%s145_s2] sm:$0x3] %v82_v10 }

// kernel: squeeze.3
= control target key start
LH: loop header
LB: loop body
LE: loop exit
PB: predicated region body
PF: predicated region fallthrough
CT: control target
= control target key end

     0   :  { %s250_s8 = smov 104   ;;  %s251_s9 = smov 112   ;;  %vm19_vm0 = vcmask 64512   ;;  %s321_s0 = inlined_call_operand.vmem [shape: bf16[1,4,128], index: 0, kind: input, shape index: {}]   ;;  %s322_s1 = inlined_call_operand.vmem [shape: bf16[4,2,8,8], index: 1, kind: output, shape index: {}]  }
   0x1   :  { %v14_v0 = vld [vmem:[%s321_s0] sm:$0x3]  ;;  %s249_s0 = smov 120   ;;  %s252_s10 = smov 96  }
   0x2   :  { %v15_v1 = vunpack.c.l.bf16 %v14_v0  ;;  %s253_s11 = smov 88   ;;  %s254_s12 = smov 80  }
   0x3   :  { %s255_s13 = smov 72   ;;  %s256_s14 = smov 64  }
   0x4   :  { %17 = vst [vmem:[#allocation1] sm:$0xf] %v15_v1  ;;  %s257_s15 = smov 56   ;;  %s258_s16 = smov 48  }
   0x5   :  { %s259_s17 = smov 40   ;;  %s260_s18 = smov 32  }
   0x6   :  { %s261_s19 = smov 24   ;;  %s262_s20 = smov 16  }
   0x7   :  { %s263_s21 = smov 8  }
   0xb   :  { %v22_v2 = vld [vmem:[#allocation1] sm:$0xf]  }
   0xc   :  { %v38_v3 = vld [vmem:[#allocation1] sm:$0xf]   ;;  %23 = vrot.lane.b32.xlu0 %v22_v2, %s249_s0 }
   0xd   :  { %39 = vrot.lane.b32.xlu1 %v38_v3, %s250_s8  ;;  %v30_v4 = vld [vmem:[#allocation1] sm:$0xf]  }
   0xe   :  { %v46_v5 = vld [vmem:[#allocation1] sm:$0xf]  }
   0xf   :  { %v18_v6 = vld [vmem:[#allocation1] sm:$0xf]  }
  0x10   :  { %31 = vrot.lane.b32.xlu0 %v30_v4, %s251_s9  ;;  %v54_v7 = vld [vmem:[#allocation1] sm:$0xf]   ;;  %20 = vst.msk [vmem:[#allocation0] ss:$16 sm:$0x3] %vm19_vm0, %v18_v6  }
  0x11   :  { %47 = vrot.lane.b32.xlu1 %v46_v5, %s252_s10  ;;  %v62_v8 = vld [vmem:[#allocation1] sm:$0xf]   ;;  %21 = vst.msk [vmem:[#allocation0] ss:$16 sm:$0xc] %vm19_vm0, %v18_v6  }
  0x12   :  { %v70_v9 = vld [vmem:[#allocation1] sm:$0xf]  }
  0x13   :  { %v78_v10 = vld [vmem:[#allocation1] sm:$0xf]  }
  0x14   :  { %55 = vrot.lane.b32.xlu0 %v54_v7, %s253_s11  ;;  %v86_v11 = vld [vmem:[#allocation1] sm:$0xf]  }
  0x15   :  { %63 = vrot.lane.b32.xlu1 %v62_v8, %s254_s12  ;;  %v94_v12 = vld [vmem:[#allocation1] sm:$0xf]  }
  0x16   :  { %v102_v13 = vld [vmem:[#allocation1] sm:$0xf]  }
  0x17   :  { %v110_v14 = vld [vmem:[#allocation1] sm:$0xf]  }
  0x18   :  { %71 = vrot.lane.b32.xlu0 %v70_v9, %s255_s13  ;;  %v118_v15 = vld [vmem:[#allocation1] sm:$0xf]  }
  0x19   :  { %79 = vrot.lane.b32.xlu1 %v78_v10, %s256_s14  ;;  %v126_v16 = vld [vmem:[#allocation1] sm:$0xf]  }
  0x1a   :  { %v134_v17 = vld [vmem:[#allocation1] sm:$0xf]  }
  0x1c   :  { %87 = vrot.lane.b32.xlu0 %v86_v11, %s257_s15 }
  0x1d   :  { %95 = vrot.lane.b32.xlu1 %v94_v12, %s258_s16 }
  0x20   :  { %103 = vrot.lane.b32.xlu0 %v102_v13, %s259_s17 }
  0x21   :  { %111 = vrot.lane.b32.xlu1 %v110_v14, %s260_s18 }
  0x24   :  { %119 = vrot.lane.b32.xlu0 %v118_v15, %s261_s19 }
  0x25   :  { %127 = vrot.lane.b32.xlu1 %v126_v16, %s262_s20 }
  0x28   :  { %135 = vrot.lane.b32.xlu0 %v134_v17, %s263_s21 }
  0x7e   :  { %v24_v18 = vpop.permute.xlu0 %23  }
  0x7f   :  { %v40_v19 = vpop.permute.xlu1 %39   ;;  %27 = vst.msk [vmem:[#allocation0 + $0x1] ss:$16 sm:$0x3] %vm19_vm0, %v24_v18   ;;  %29 = vst.msk [vmem:[#allocation0 + $0x1] ss:$16 sm:$0xc] %vm19_vm0, %v24_v18  }
  0x80   :  { %43 = vst.msk [vmem:[#allocation0 + $0x3] ss:$16 sm:$0x3] %vm19_vm0, %v40_v19   ;;  %45 = vst.msk [vmem:[#allocation0 + $0x3] ss:$16 sm:$0xc] %vm19_vm0, %v40_v19  }
  0x82   :  { %v32_v20 = vpop.permute.xlu0 %31  }
  0x83   :  { %v48_v21 = vpop.permute.xlu1 %47   ;;  %35 = vst.msk [vmem:[#allocation0 + $0x2] ss:$16 sm:$0x3] %vm19_vm0, %v32_v20   ;;  %37 = vst.msk [vmem:[#allocation0 + $0x2] ss:$16 sm:$0xc] %vm19_vm0, %v32_v20  }
  0x84   :  { %51 = vst.msk [vmem:[#allocation0 + $0x4] ss:$16 sm:$0x3] %vm19_vm0, %v48_v21   ;;  %53 = vst.msk [vmem:[#allocation0 + $0x4] ss:$16 sm:$0xc] %vm19_vm0, %v48_v21  }
  0x86   :  { %v56_v22 = vpop.permute.xlu0 %55  }
  0x87   :  { %v64_v23 = vpop.permute.xlu1 %63   ;;  %59 = vst.msk [vmem:[#allocation0 + $0x5] ss:$16 sm:$0x3] %vm19_vm0, %v56_v22   ;;  %61 = vst.msk [vmem:[#allocation0 + $0x5] ss:$16 sm:$0xc] %vm19_vm0, %v56_v22  }
  0x88   :  { %67 = vst.msk [vmem:[#allocation0 + $0x6] ss:$16 sm:$0x3] %vm19_vm0, %v64_v23   ;;  %69 = vst.msk [vmem:[#allocation0 + $0x6] ss:$16 sm:$0xc] %vm19_vm0, %v64_v23  }
  0x8a   :  { %v72_v24 = vpop.permute.xlu0 %71  }
  0x8b   :  { %v80_v25 = vpop.permute.xlu1 %79   ;;  %75 = vst.msk [vmem:[#allocation0 + $0x7] ss:$16 sm:$0x3] %vm19_vm0, %v72_v24   ;;  %77 = vst.msk [vmem:[#allocation0 + $0x7] ss:$16 sm:$0xc] %vm19_vm0, %v72_v24  }
  0x8c   :  { %83 = vst.msk [vmem:[#allocation0 + $0x8] ss:$16 sm:$0x3] %vm19_vm0, %v80_v25   ;;  %85 = vst.msk [vmem:[#allocation0 + $0x8] ss:$16 sm:$0xc] %vm19_vm0, %v80_v25  }
  0x8e   :  { %v88_v26 = vpop.permute.xlu0 %87  }
  0x8f   :  { %v96_v27 = vpop.permute.xlu1 %95   ;;  %91 = vst.msk [vmem:[#allocation0 + $0x9] ss:$16 sm:$0x3] %vm19_vm0, %v88_v26   ;;  %93 = vst.msk [vmem:[#allocation0 + $0x9] ss:$16 sm:$0xc] %vm19_vm0, %v88_v26  }
  0x90   :  { %99 = vst.msk [vmem:[#allocation0 + $0xa] ss:$16 sm:$0x3] %vm19_vm0, %v96_v27   ;;  %101 = vst.msk [vmem:[#allocation0 + $0xa] ss:$16 sm:$0xc] %vm19_vm0, %v96_v27  }
  0x92   :  { %v104_v28 = vpop.permute.xlu0 %103   ;;  %v146_v33 = vld [vmem:[#allocation0] sm:$0xff]  ;;  %v157_v34 = vld [vmem:[#allocation0 + $0x10] sm:$0xff] }
  0x93   :  { %v112_v29 = vpop.permute.xlu1 %111   ;;  %107 = vst.msk [vmem:[#allocation0 + $0xb] ss:$16 sm:$0x3] %vm19_vm0, %v104_v28   ;;  %109 = vst.msk [vmem:[#allocation0 + $0xb] ss:$16 sm:$0xc] %vm19_vm0, %v104_v28  }
  0x94   :  { %115 = vst.msk [vmem:[#allocation0 + $0xc] ss:$16 sm:$0x3] %vm19_vm0, %v112_v29   ;;  %117 = vst.msk [vmem:[#allocation0 + $0xc] ss:$16 sm:$0xc] %vm19_vm0, %v112_v29  }
  0x95   :  { %v171_v35 = vld [vmem:[#allocation0 + $0x20] sm:$0xff]  ;;  %v185_v39 = vld [vmem:[#allocation0 + $0x30] sm:$0xff] }
  0x96   :  { %v120_v30 = vpop.permute.xlu0 %119  }
  0x97   :  { %v128_v31 = vpop.permute.xlu1 %127   ;;  %123 = vst.msk [vmem:[#allocation0 + $0xd] ss:$16 sm:$0x3] %vm19_vm0, %v120_v30   ;;  %125 = vst.msk [vmem:[#allocation0 + $0xd] ss:$16 sm:$0xc] %vm19_vm0, %v120_v30  }
  0x98   :  { %131 = vst.msk [vmem:[#allocation0 + $0xe] ss:$16 sm:$0x3] %vm19_vm0, %v128_v31   ;;  %133 = vst.msk [vmem:[#allocation0 + $0xe] ss:$16 sm:$0xc] %vm19_vm0, %v128_v31  }
  0x9a   :  { %v136_v32 = vpop.permute.xlu0 %135  }
  0x9b   :  { %139 = vst.msk [vmem:[#allocation0 + $0xf] ss:$16 sm:$0x3] %vm19_vm0, %v136_v32   ;;  %141 = vst.msk [vmem:[#allocation0 + $0xf] ss:$16 sm:$0xc] %vm19_vm0, %v136_v32  }
  0xa2   :  { %v151_v36 = vld [vmem:[#allocation0 + $0x8] sm:$0xff]  ;;  %v164_v37 = vld [vmem:[#allocation0 + $0x18] sm:$0xff] }
  0xa3   :  { %v178_v38 = vld [vmem:[#allocation0 + $0x28] sm:$0xff]  ;;  %v214_v40 = vpack.c.bf16 %v151_v36, %v146_v33  ;;  %v219_v41 = vpack.c.bf16 %v164_v37, %v157_v34  ;;  %v192_v43 = vld [vmem:[#allocation0 + $0x38] sm:$0xff] }
  0xa4   :  { %v224_v42 = vpack.c.bf16 %v178_v38, %v171_v35  ;;  %v229_v44 = vpack.c.bf16 %v192_v43, %v185_v39 }
  0xa5   :  { %215 = vst [vmem:[%s322_s1] sm:$0xff] %v214_v40   ;;  %231 = vst [vmem:[%s322_s1 + $0x8] sm:$0xff] %v219_v41  }
  0xa6   :  { %232 = vst [vmem:[%s322_s1 + $0x10] sm:$0xff] %v224_v42   ;;  %233 = vst [vmem:[%s322_s1 + $0x18] sm:$0xff] %v229_v44  }

// kernel: dcgan_g_nobn_forward.7
= control target key start
LH: loop header
LB: loop body
LE: loop exit
PB: predicated region body
PF: predicated region fallthrough
CT: control target
= control target key end

     0   :  { %s451_s9 = smov 0   ;;  %s453_s10 = smov 0   ;;  %s494_s0 = inlined_call_operand.vmem [shape: bf16[4,3,16], index: 0, kind: input, shape index: {}]   ;;  %s495_s1 = inlined_call_operand.vmem [shape: bf16[4,16,128], index: 1, kind: input, shape index: {}]   ;;  %s496_s2 = inlined_call_operand.vmem [shape: f32[4,3,128], index: 2, kind: output, shape index: {}]  }
   0x1   :  { %s455_s11 = smov 0  }
   0x2 LB: > { %s24_s12 = sadd.s32 1, %s428_s10  ;;  %p361_p0 = scmp.ge.s32.totalorder %s432_s11, 1  ;;  %s432_s11 = sphi %s455_s11, %s12_s11   ;;  %s428_s10 = sphi %s453_s10, %s498_s10   ;;  %s424_s9 = sphi %s451_s9, %s497_s9  }
   0x3   : > { %p26_p1 = scmp.ge.s32.totalorder %s24_s12, 4  ;;  %p140_p2 = scmp.lt.s32.totalorder %s432_s11, 5 }
   0x5   : > { %s500_s12 = smov (%p26_p1, %s24_s12), 0  ;;  %p141_p3 = pnand %p361_p0, %p140_p2 }
   0x6   : > { %p171_p4 = scmp.lt.s32.totalorder (!%p141_p3), %s424_s9, 3  ;;  %v434_v0 = vmov (!%p141_p3), 0.0   ;;  %vm435_vm0 = vmmov (!%p141_p3), 0   ;;  %vm200_vm1 = vcmask (!%p141_p3), 130048   ;;  %vm244_vm2 = vcmask (!%p141_p3), 1042432  }
   0x7   : > { %144 = sbr.rel (%p141_p3) target bundleno = 294 (0x126), region = 28  ;;  %373 = vmatprep.subr.bf16.mxu0 (!%p141_p3), %v434_v0  ;;  %375 = vmatprep.mubr.msk.bf16.mxu0 (!%p141_p3), %vm435_vm0, %v434_v0 }
   0xe   : > { %s502_s9 = smov (!%p171_p4, %s424_s9), 3 }
   0xf   : > { %s370_s13 = sshll.u32 %s502_s9, 3  ;;  %s362_s17 = sshll.u32 %s502_s9, 1 }
  0x10   : > { %s182_s16 = scalar_lea.vmem %s495_s1, %s370_s13  ;;  %s174_s20 = scalar_lea.vmem %s494_s0, %s362_s17 }
  0x11   : > { %v405_v1 = vld [vmem:[%s182_s16] sm:$0xff]   ;;  %s365_s21 = sshll.u32 %s502_s9, 2 }
  0x12   : > { %374 = vmatpush3.bf16.msra.mxu0 %v405_v1  ;;  %v191_v2 = vld [vmem:[%s174_s20] sm:$0x3]  ;;  %s189_s24 = scalar_lea.vmem %s496_s2, %s365_s21 }
  0x15   : > { %376 = vmatmul.mubr.msk.bf16.vlgmr.msra.gmra.mrb[0].mxu0 %vm200_vm1, %v191_v2 }
  0xe8   : > { %v238_v3 = vpop.f32.mrb[0].mxu0 }
  0xe9   : > { %v245_v4 = vsel %vm244_vm2, %v238_v3, -inf  ;;  %v377_v5 = vpop.f32.mrb[1].mxu0 }
  0xea   : > { %v246_v6 = vrot.slane %v245_v4, 4  ;;  %v241_v7 = vpop.f32.mrb[2].mxu0 }
  0xeb   : > { %v378_v8 = vpop.f32.mrb[3].mxu0 }
  0xec   : > { %v247_v9 = vmax.f32 %v245_v4, %v246_v6 }
  0xee   : > { %v248_v10 = vrot.slane %v247_v9, 2 }
  0xf0   : > { %v249_v11 = vmax.f32 %v247_v9, %v248_v10 }
  0xf2   : > { %v250_v12 = vrot.slane %v249_v11, 1 }
  0xf4   : > { %v251_v13 = vmax.f32 %v249_v11, %v250_v12 }
  0xf6   : > { %v252_v14 = vsub.f32 %v238_v3, %v251_v13 }
  0xf8   : > { %v253_v15 = vmul.f32 1.442695, %v252_v14 }
  0xfa   : > { %406 = vpow2.f32 %v253_v15 }
 0x104   : > { %v407_v16 = vpop.eup %406 }
 0x105   : > { %v255_v17 = vsel %vm244_vm2, %v407_v16, 0.0 }
 0x106   : > { %v256_v18 = vrot.slane %v255_v17, 4 }
 0x108   : > { %v257_v19 = vadd.f32 %v256_v18, %v255_v17 }
 0x10a   : > { %v258_v20 = vrot.slane %v257_v19, 2 }
 0x10c   : > { %v259_v21 = vadd.f32 %v258_v20, %v257_v19 }
 0x10e   : > { %v260_v22 = vrot.slane %v259_v21, 1 }
 0x110   : > { %v261_v23 = vadd.f32 %v260_v22, %v259_v21 }
 0x112   : > { %408 = vrcp.f32 %v261_v23 }
 0x11c   : > { %v409_v24 = vpop.eup %408 }
 0x11d   : > { %v263_v25 = vmul.f32 %v409_v24, %v261_v23 }
 0x11f   : > { %v264_v26 = vsub.f32 2.0, %v263_v25 }
 0x121   : > { %v265_v27 = vmul.f32 %v409_v24, %v264_v26 }
 0x123   : > { %v266_v28 = vmul.f32 %v407_v16, %v265_v27 }
 0x125   : > { %267 = vst [vmem:[%s189_s24] sm:$0x7] %v266_v28 }
 0x126 PF: > { %s12_s11 = sadd.s32 1, %s432_s11   ;;  %s497_s9 = smov %s428_s10 }
 0x127   : > { %p9_p5 = scmp.ge.s32.totalorder %s12_s11, 6   ;;  %s498_s10 = smov %s500_s12 }
 0x129   :  { %11 = sbr.rel (!%p9_p5) target bundleno = 2 (0x2), region = 61 }

</bundles_post_ra>
